<compile_context>
chip_gen: v7x
topology: tpu7x:2x2x1
jax: 0.10.0
libtpu: 0.0.40
codegen_flags: <defaults>
</compile_context>

<pallas_src>
import functools

import jax
import jax.numpy as jnp
from jax.experimental import pallas as pl
from jax.experimental.pallas import tpu as pltpu

HIDDEN = 32
LANES = 128
SUBLANES = 8
STRIP_ROWS = 64        # 8 f32 vregs per (strip, 128) array -> register-resident strips
MAX_TILE_ROWS = 2048   # 1 MiB f32 per block; ~4 MiB with double-buffered in+out


def _round_up(a, b):
    return ((a + b - 1) // b) * b


def _cdiv(a, b):
    return -(-a // b)


def mlp_kernel(w1_ref, b1_ref, w2_ref, b2_ref, x_ref, o_ref, *, strip_rows, n_strips):
    # w1_ref, b1_ref, w2_ref : SMEM (HIDDEN,) f32   b2_ref : SMEM (1,) f32
    # x_ref, o_ref           : VMEM (tile_rows, 128) f32
    b2 = b2_ref[0]

    @pl.loop(0, n_strips)
    def _(s):
        r = pl.multiple_of(s * strip_rows, strip_rows)
        xs = x_ref[pl.ds(r, strip_rows), :]                       # one vld per vreg
        # j = 0 term initialises the accumulator (no tile-wide splat of b2).
        acc = w2_ref[0] * jnp.maximum(w1_ref[0] * xs + b1_ref[0], 0.0)
        # Fully unrolled hidden-unit accumulation over the register-resident strip.
        for j in range(1, HIDDEN):
            acc = acc + w2_ref[j] * jnp.maximum(w1_ref[j] * xs + b1_ref[j], 0.0)
        z = acc + b2
        # Numerically stable softplus: max(z,0) + log1p(exp(-|z|)) (== jax.nn.softplus)
        sp = jnp.maximum(z, 0.0) + jnp.log1p(jnp.exp(-jnp.abs(z)))
        o_ref[pl.ds(r, strip_rows), :] = sp.astype(o_ref.dtype)   # one vst per vreg


def predict_model_forward(x, w_in, b_in, w_out, b_out):
    """x: (B, 1) f32. w_in: any shape with HIDDEN elems (Linear(1,H).weight),
    b_in: (HIDDEN,), w_out: any shape with HIDDEN elems (Linear(H,1).weight),
    b_out: (1,). Returns (B, 1) f32."""
    B = x.shape[0]

    w1 = jnp.asarray(w_in, jnp.float32).reshape(HIDDEN)
    b1 = jnp.asarray(b_in, jnp.float32).reshape(HIDDEN)
    w2 = jnp.asarray(w_out, jnp.float32).reshape(HIDDEN)
    b2 = jnp.asarray(b_out, jnp.float32).reshape(1)

    # ---- tiling: lane-dense rows of 128 batch elements ----
    rows_needed = max(1, _cdiv(B, LANES))
    # >= 2 grid tiles whenever there is more than one 8-row group, so the
    # "parallel" axis actually splits across v7x's two TensorCores.
    if rows_needed > SUBLANES:
        target_tile = _round_up(_cdiv(rows_needed, 2), SUBLANES)
    else:
        target_tile = _round_up(rows_needed, SUBLANES)
    tile_rows = min(MAX_TILE_ROWS, target_tile)
    # Strip size for the register-resident inner loop; tile must be a multiple of it.
    strip_rows = min(STRIP_ROWS, tile_rows)
    tile_rows = _round_up(tile_rows, strip_rows)
    n_strips = tile_rows // strip_rows

    padded_rows = _round_up(rows_needed, tile_rows)
    num_tiles = padded_rows // tile_rows
    total = padded_rows * LANES

    # Lane-dense layout: flatten -> pad (zeros are harmless for relu/softplus and
    # are sliced off below; pointwise op so they never contaminate valid lanes).
    x_flat = x.reshape(-1).astype(jnp.float32)
    x_flat = jnp.pad(x_flat, (0, total - B))
    x2d = x_flat.reshape(padded_rows, LANES)

    smem_spec = pl.BlockSpec(memory_space=pltpu.MemorySpace.SMEM)
    kernel = functools.partial(mlp_kernel, strip_rows=strip_rows, n_strips=n_strips)

    out2d = pl.pallas_call(
        kernel,
        out_shape=jax.ShapeDtypeStruct((padded_rows, LANES), jnp.float32),
        grid=(num_tiles,),
        in_specs=[
            smem_spec,  # w1
            smem_spec,  # b1
            smem_spec,  # w2
            smem_spec,  # b_out
            pl.BlockSpec((tile_rows, LANES), lambda i: (i, 0)),  # x tile
        ],
        out_specs=pl.BlockSpec((tile_rows, LANES), lambda i: (i, 0)),
        compiler_params=pltpu.CompilerParams(
            dimension_semantics=("parallel",),  # shard batch tiles across TCs on v7x
        ),
    )(w1, b1, w2, b2, x2d)

    # Restore the (B, 1) module output shape. (Consumers that can take the padded
    # (rows, 128) slab directly could skip this extra HBM pass.)
    return out2d.reshape(-1)[:B].reshape(B, 1)


def init_params(key):
    """Deterministic init mirroring the module (kaiming-normal weights, relu gain;
    torch-default uniform biases). Returned as flat vectors for the VPU kernel."""
    k1, k2, k3, k4 = jax.random.split(key, 4)
    # input_layer: Linear(1, 32) -> weight (32, 1), kaiming std = sqrt(2/1)
    w1 = jax.random.normal(k1, (HIDDEN,), jnp.float32) * jnp.sqrt(2.0 / 1.0)
    b1 = jax.random.uniform(k2, (HIDDEN,), jnp.float32, -1.0, 1.0)  # bound = 1/sqrt(1)
    # output_layer: Linear(32, 1) -> weight (1, 32), kaiming std = sqrt(2/32)
    w2 = jax.random.normal(k3, (HIDDEN,), jnp.float32) * jnp.sqrt(2.0 / HIDDEN)
    b2 = jax.random.uniform(
        k4, (1,), jnp.float32, -1.0 / jnp.sqrt(HIDDEN), 1.0 / jnp.sqrt(HIDDEN)
    )
    return w1, b1, w2, b2


if __name__ == "__main__":
    key = jax.random.PRNGKey(0)
    kx, kp = jax.random.split(key)

    B = 8
    x = jax.random.normal(kx, (B, 1), jnp.float32)
    w1, b1, w2, b2 = init_params(kp)

    out = predict_model_forward(x, w1, b1, w2, b2)
    out = jax.block_until_ready(out)

    # Pure-JAX reference (matrix form of the same forward pass).
    ref_h = jnp.maximum(x @ w1.reshape(1, HIDDEN) + b1[None, :], 0.0)
    ref = jax.nn.softplus(ref_h @ w2.reshape(HIDDEN, 1) + b2[None, :])
    assert out.shape == (B, 1)
    assert jnp.allclose(out, ref, atol=1e-5, rtol=1e-5)

    print("KERNEL_OK")
</pallas_src>

<mosaic_0001>
module attributes {stable_mosaic.version = 11 : i64} {
  func.func @mlp_kernel(%arg0: i32, %arg1: memref<32xf32, #tpu.memory_space<smem>>, %arg2: memref<32xf32, #tpu.memory_space<smem>>, %arg3: memref<32xf32, #tpu.memory_space<smem>>, %arg4: memref<1xf32, #tpu.memory_space<smem>>, %arg5: memref<8x128xf32, #tpu.memory_space<vmem>>, %arg6: memref<8x128xf32, #tpu.memory_space<vmem>>) attributes {dimension_semantics = [#tpu.dimension_semantics<parallel>], iteration_bounds = array<i64: 1>, scalar_prefetch = 0 : i64, scratch_operands = 0 : i64, tpu.core_type = #tpu.core_type<tc>, window_params = [{transform_indices = @transform_0, window_bounds = array<i64: 32>}, {transform_indices = @transform_1, window_bounds = array<i64: 32>}, {transform_indices = @transform_2, window_bounds = array<i64: 32>}, {transform_indices = @transform_3, window_bounds = array<i64: 1>}, {transform_indices = @transform_4, window_bounds = array<i64: 8, 128>}, {transform_indices = @transform_5, window_bounds = array<i64: 8, 128>}]} {
    %c0 = arith.constant 0 : index
    %0 = memref.load %arg4[%c0] : memref<1xf32, #tpu.memory_space<smem>>
    %c0_i32 = arith.constant 0 : i32
    %c1_i32 = arith.constant 1 : i32
    %1 = arith.muli %c0_i32, %c1_i32 : i32
    %c0_i32_0 = arith.constant 0 : i32
    %2 = arith.addi %c0_i32_0, %1 : i32
    %c8_i32 = arith.constant 8 : i32
    %3 = arith.muli %2, %c8_i32 : i32
    %4 = tpu.assume_multiple %3, 8 : i32
    %5 = arith.index_cast %4 : i32 to index
    %c0_1 = arith.constant 0 : index
    %6 = vector.load %arg5[%5, %c0_1] : memref<8x128xf32, #tpu.memory_space<vmem>>, vector<8x128xf32>
    %c0_2 = arith.constant 0 : index
    %7 = memref.load %arg3[%c0_2] : memref<32xf32, #tpu.memory_space<smem>>
    %c0_3 = arith.constant 0 : index
    %8 = memref.load %arg1[%c0_3] : memref<32xf32, #tpu.memory_space<smem>>
    %9 = vector.broadcast %8 : f32 to vector<8x128xf32>
    %10 = arith.mulf %9, %6 : vector<8x128xf32>
    %c0_4 = arith.constant 0 : index
    %11 = memref.load %arg2[%c0_4] : memref<32xf32, #tpu.memory_space<smem>>
    %12 = vector.broadcast %11 : f32 to vector<8x128xf32>
    %13 = arith.addf %10, %12 : vector<8x128xf32>
    %cst = arith.constant 0.000000e+00 : f32
    %14 = vector.broadcast %cst : f32 to vector<8x128xf32>
    %15 = arith.maximumf %13, %14 : vector<8x128xf32>
    %16 = vector.broadcast %7 : f32 to vector<8x128xf32>
    %17 = arith.mulf %16, %15 : vector<8x128xf32>
    %c1 = arith.constant 1 : index
    %18 = memref.load %arg3[%c1] : memref<32xf32, #tpu.memory_space<smem>>
    %c1_5 = arith.constant 1 : index
    %19 = memref.load %arg1[%c1_5] : memref<32xf32, #tpu.memory_space<smem>>
    %20 = vector.broadcast %19 : f32 to vector<8x128xf32>
    %21 = arith.mulf %20, %6 : vector<8x128xf32>
    %c1_6 = arith.constant 1 : index
    %22 = memref.load %arg2[%c1_6] : memref<32xf32, #tpu.memory_space<smem>>
    %23 = vector.broadcast %22 : f32 to vector<8x128xf32>
    %24 = arith.addf %21, %23 : vector<8x128xf32>
    %cst_7 = arith.constant 0.000000e+00 : f32
    %25 = vector.broadcast %cst_7 : f32 to vector<8x128xf32>
    %26 = arith.maximumf %24, %25 : vector<8x128xf32>
    %27 = vector.broadcast %18 : f32 to vector<8x128xf32>
    %28 = arith.mulf %27, %26 : vector<8x128xf32>
    %29 = arith.addf %17, %28 : vector<8x128xf32>
    %c2 = arith.constant 2 : index
    %30 = memref.load %arg3[%c2] : memref<32xf32, #tpu.memory_space<smem>>
    %c2_8 = arith.constant 2 : index
    %31 = memref.load %arg1[%c2_8] : memref<32xf32, #tpu.memory_space<smem>>
    %32 = vector.broadcast %31 : f32 to vector<8x128xf32>
    %33 = arith.mulf %32, %6 : vector<8x128xf32>
    %c2_9 = arith.constant 2 : index
    %34 = memref.load %arg2[%c2_9] : memref<32xf32, #tpu.memory_space<smem>>
    %35 = vector.broadcast %34 : f32 to vector<8x128xf32>
    %36 = arith.addf %33, %35 : vector<8x128xf32>
    %cst_10 = arith.constant 0.000000e+00 : f32
    %37 = vector.broadcast %cst_10 : f32 to vector<8x128xf32>
    %38 = arith.maximumf %36, %37 : vector<8x128xf32>
    %39 = vector.broadcast %30 : f32 to vector<8x128xf32>
    %40 = arith.mulf %39, %38 : vector<8x128xf32>
    %41 = arith.addf %29, %40 : vector<8x128xf32>
    %c3 = arith.constant 3 : index
    %42 = memref.load %arg3[%c3] : memref<32xf32, #tpu.memory_space<smem>>
    %c3_11 = arith.constant 3 : index
    %43 = memref.load %arg1[%c3_11] : memref<32xf32, #tpu.memory_space<smem>>
    %44 = vector.broadcast %43 : f32 to vector<8x128xf32>
    %45 = arith.mulf %44, %6 : vector<8x128xf32>
    %c3_12 = arith.constant 3 : index
    %46 = memref.load %arg2[%c3_12] : memref<32xf32, #tpu.memory_space<smem>>
    %47 = vector.broadcast %46 : f32 to vector<8x128xf32>
    %48 = arith.addf %45, %47 : vector<8x128xf32>
    %cst_13 = arith.constant 0.000000e+00 : f32
    %49 = vector.broadcast %cst_13 : f32 to vector<8x128xf32>
    %50 = arith.maximumf %48, %49 : vector<8x128xf32>
    %51 = vector.broadcast %42 : f32 to vector<8x128xf32>
    %52 = arith.mulf %51, %50 : vector<8x128xf32>
    %53 = arith.addf %41, %52 : vector<8x128xf32>
    %c4 = arith.constant 4 : index
    %54 = memref.load %arg3[%c4] : memref<32xf32, #tpu.memory_space<smem>>
    %c4_14 = arith.constant 4 : index
    %55 = memref.load %arg1[%c4_14] : memref<32xf32, #tpu.memory_space<smem>>
    %56 = vector.broadcast %55 : f32 to vector<8x128xf32>
    %57 = arith.mulf %56, %6 : vector<8x128xf32>
    %c4_15 = arith.constant 4 : index
    %58 = memref.load %arg2[%c4_15] : memref<32xf32, #tpu.memory_space<smem>>
    %59 = vector.broadcast %58 : f32 to vector<8x128xf32>
    %60 = arith.addf %57, %59 : vector<8x128xf32>
    %cst_16 = arith.constant 0.000000e+00 : f32
    %61 = vector.broadcast %cst_16 : f32 to vector<8x128xf32>
    %62 = arith.maximumf %60, %61 : vector<8x128xf32>
    %63 = vector.broadcast %54 : f32 to vector<8x128xf32>
    %64 = arith.mulf %63, %62 : vector<8x128xf32>
    %65 = arith.addf %53, %64 : vector<8x128xf32>
    %c5 = arith.constant 5 : index
    %66 = memref.load %arg3[%c5] : memref<32xf32, #tpu.memory_space<smem>>
    %c5_17 = arith.constant 5 : index
    %67 = memref.load %arg1[%c5_17] : memref<32xf32, #tpu.memory_space<smem>>
    %68 = vector.broadcast %67 : f32 to vector<8x128xf32>
    %69 = arith.mulf %68, %6 : vector<8x128xf32>
    %c5_18 = arith.constant 5 : index
    %70 = memref.load %arg2[%c5_18] : memref<32xf32, #tpu.memory_space<smem>>
    %71 = vector.broadcast %70 : f32 to vector<8x128xf32>
    %72 = arith.addf %69, %71 : vector<8x128xf32>
    %cst_19 = arith.constant 0.000000e+00 : f32
    %73 = vector.broadcast %cst_19 : f32 to vector<8x128xf32>
    %74 = arith.maximumf %72, %73 : vector<8x128xf32>
    %75 = vector.broadcast %66 : f32 to vector<8x128xf32>
    %76 = arith.mulf %75, %74 : vector<8x128xf32>
    %77 = arith.addf %65, %76 : vector<8x128xf32>
    %c6 = arith.constant 6 : index
    %78 = memref.load %arg3[%c6] : memref<32xf32, #tpu.memory_space<smem>>
    %c6_20 = arith.constant 6 : index
    %79 = memref.load %arg1[%c6_20] : memref<32xf32, #tpu.memory_space<smem>>
    %80 = vector.broadcast %79 : f32 to vector<8x128xf32>
    %81 = arith.mulf %80, %6 : vector<8x128xf32>
    %c6_21 = arith.constant 6 : index
    %82 = memref.load %arg2[%c6_21] : memref<32xf32, #tpu.memory_space<smem>>
    %83 = vector.broadcast %82 : f32 to vector<8x128xf32>
    %84 = arith.addf %81, %83 : vector<8x128xf32>
    %cst_22 = arith.constant 0.000000e+00 : f32
    %85 = vector.broadcast %cst_22 : f32 to vector<8x128xf32>
    %86 = arith.maximumf %84, %85 : vector<8x128xf32>
    %87 = vector.broadcast %78 : f32 to vector<8x128xf32>
    %88 = arith.mulf %87, %86 : vector<8x128xf32>
    %89 = arith.addf %77, %88 : vector<8x128xf32>
    %c7 = arith.constant 7 : index
    %90 = memref.load %arg3[%c7] : memref<32xf32, #tpu.memory_space<smem>>
    %c7_23 = arith.constant 7 : index
    %91 = memref.load %arg1[%c7_23] : memref<32xf32, #tpu.memory_space<smem>>
    %92 = vector.broadcast %91 : f32 to vector<8x128xf32>
    %93 = arith.mulf %92, %6 : vector<8x128xf32>
    %c7_24 = arith.constant 7 : index
    %94 = memref.load %arg2[%c7_24] : memref<32xf32, #tpu.memory_space<smem>>
    %95 = vector.broadcast %94 : f32 to vector<8x128xf32>
    %96 = arith.addf %93, %95 : vector<8x128xf32>
    %cst_25 = arith.constant 0.000000e+00 : f32
    %97 = vector.broadcast %cst_25 : f32 to vector<8x128xf32>
    %98 = arith.maximumf %96, %97 : vector<8x128xf32>
    %99 = vector.broadcast %90 : f32 to vector<8x128xf32>
    %100 = arith.mulf %99, %98 : vector<8x128xf32>
    %101 = arith.addf %89, %100 : vector<8x128xf32>
    %c8 = arith.constant 8 : index
    %102 = memref.load %arg3[%c8] : memref<32xf32, #tpu.memory_space<smem>>
    %c8_26 = arith.constant 8 : index
    %103 = memref.load %arg1[%c8_26] : memref<32xf32, #tpu.memory_space<smem>>
    %104 = vector.broadcast %103 : f32 to vector<8x128xf32>
    %105 = arith.mulf %104, %6 : vector<8x128xf32>
    %c8_27 = arith.constant 8 : index
    %106 = memref.load %arg2[%c8_27] : memref<32xf32, #tpu.memory_space<smem>>
    %107 = vector.broadcast %106 : f32 to vector<8x128xf32>
    %108 = arith.addf %105, %107 : vector<8x128xf32>
    %cst_28 = arith.constant 0.000000e+00 : f32
    %109 = vector.broadcast %cst_28 : f32 to vector<8x128xf32>
    %110 = arith.maximumf %108, %109 : vector<8x128xf32>
    %111 = vector.broadcast %102 : f32 to vector<8x128xf32>
    %112 = arith.mulf %111, %110 : vector<8x128xf32>
    %113 = arith.addf %101, %112 : vector<8x128xf32>
    %c9 = arith.constant 9 : index
    %114 = memref.load %arg3[%c9] : memref<32xf32, #tpu.memory_space<smem>>
    %c9_29 = arith.constant 9 : index
    %115 = memref.load %arg1[%c9_29] : memref<32xf32, #tpu.memory_space<smem>>
    %116 = vector.broadcast %115 : f32 to vector<8x128xf32>
    %117 = arith.mulf %116, %6 : vector<8x128xf32>
    %c9_30 = arith.constant 9 : index
    %118 = memref.load %arg2[%c9_30] : memref<32xf32, #tpu.memory_space<smem>>
    %119 = vector.broadcast %118 : f32 to vector<8x128xf32>
    %120 = arith.addf %117, %119 : vector<8x128xf32>
    %cst_31 = arith.constant 0.000000e+00 : f32
    %121 = vector.broadcast %cst_31 : f32 to vector<8x128xf32>
    %122 = arith.maximumf %120, %121 : vector<8x128xf32>
    %123 = vector.broadcast %114 : f32 to vector<8x128xf32>
    %124 = arith.mulf %123, %122 : vector<8x128xf32>
    %125 = arith.addf %113, %124 : vector<8x128xf32>
    %c10 = arith.constant 10 : index
    %126 = memref.load %arg3[%c10] : memref<32xf32, #tpu.memory_space<smem>>
    %c10_32 = arith.constant 10 : index
    %127 = memref.load %arg1[%c10_32] : memref<32xf32, #tpu.memory_space<smem>>
    %128 = vector.broadcast %127 : f32 to vector<8x128xf32>
    %129 = arith.mulf %128, %6 : vector<8x128xf32>
    %c10_33 = arith.constant 10 : index
    %130 = memref.load %arg2[%c10_33] : memref<32xf32, #tpu.memory_space<smem>>
    %131 = vector.broadcast %130 : f32 to vector<8x128xf32>
    %132 = arith.addf %129, %131 : vector<8x128xf32>
    %cst_34 = arith.constant 0.000000e+00 : f32
    %133 = vector.broadcast %cst_34 : f32 to vector<8x128xf32>
    %134 = arith.maximumf %132, %133 : vector<8x128xf32>
    %135 = vector.broadcast %126 : f32 to vector<8x128xf32>
    %136 = arith.mulf %135, %134 : vector<8x128xf32>
    %137 = arith.addf %125, %136 : vector<8x128xf32>
    %c11 = arith.constant 11 : index
    %138 = memref.load %arg3[%c11] : memref<32xf32, #tpu.memory_space<smem>>
    %c11_35 = arith.constant 11 : index
    %139 = memref.load %arg1[%c11_35] : memref<32xf32, #tpu.memory_space<smem>>
    %140 = vector.broadcast %139 : f32 to vector<8x128xf32>
    %141 = arith.mulf %140, %6 : vector<8x128xf32>
    %c11_36 = arith.constant 11 : index
    %142 = memref.load %arg2[%c11_36] : memref<32xf32, #tpu.memory_space<smem>>
    %143 = vector.broadcast %142 : f32 to vector<8x128xf32>
    %144 = arith.addf %141, %143 : vector<8x128xf32>
    %cst_37 = arith.constant 0.000000e+00 : f32
    %145 = vector.broadcast %cst_37 : f32 to vector<8x128xf32>
    %146 = arith.maximumf %144, %145 : vector<8x128xf32>
    %147 = vector.broadcast %138 : f32 to vector<8x128xf32>
    %148 = arith.mulf %147, %146 : vector<8x128xf32>
    %149 = arith.addf %137, %148 : vector<8x128xf32>
    %c12 = arith.constant 12 : index
    %150 = memref.load %arg3[%c12] : memref<32xf32, #tpu.memory_space<smem>>
    %c12_38 = arith.constant 12 : index
    %151 = memref.load %arg1[%c12_38] : memref<32xf32, #tpu.memory_space<smem>>
    %152 = vector.broadcast %151 : f32 to vector<8x128xf32>
    %153 = arith.mulf %152, %6 : vector<8x128xf32>
    %c12_39 = arith.constant 12 : index
    %154 = memref.load %arg2[%c12_39] : memref<32xf32, #tpu.memory_space<smem>>
    %155 = vector.broadcast %154 : f32 to vector<8x128xf32>
    %156 = arith.addf %153, %155 : vector<8x128xf32>
    %cst_40 = arith.constant 0.000000e+00 : f32
    %157 = vector.broadcast %cst_40 : f32 to vector<8x128xf32>
    %158 = arith.maximumf %156, %157 : vector<8x128xf32>
    %159 = vector.broadcast %150 : f32 to vector<8x128xf32>
    %160 = arith.mulf %159, %158 : vector<8x128xf32>
    %161 = arith.addf %149, %160 : vector<8x128xf32>
    %c13 = arith.constant 13 : index
    %162 = memref.load %arg3[%c13] : memref<32xf32, #tpu.memory_space<smem>>
    %c13_41 = arith.constant 13 : index
    %163 = memref.load %arg1[%c13_41] : memref<32xf32, #tpu.memory_space<smem>>
    %164 = vector.broadcast %163 : f32 to vector<8x128xf32>
    %165 = arith.mulf %164, %6 : vector<8x128xf32>
    %c13_42 = arith.constant 13 : index
    %166 = memref.load %arg2[%c13_42] : memref<32xf32, #tpu.memory_space<smem>>
    %167 = vector.broadcast %166 : f32 to vector<8x128xf32>
    %168 = arith.addf %165, %167 : vector<8x128xf32>
    %cst_43 = arith.constant 0.000000e+00 : f32
    %169 = vector.broadcast %cst_43 : f32 to vector<8x128xf32>
    %170 = arith.maximumf %168, %169 : vector<8x128xf32>
    %171 = vector.broadcast %162 : f32 to vector<8x128xf32>
    %172 = arith.mulf %171, %170 : vector<8x128xf32>
    %173 = arith.addf %161, %172 : vector<8x128xf32>
    %c14 = arith.constant 14 : index
    %174 = memref.load %arg3[%c14] : memref<32xf32, #tpu.memory_space<smem>>
    %c14_44 = arith.constant 14 : index
    %175 = memref.load %arg1[%c14_44] : memref<32xf32, #tpu.memory_space<smem>>
    %176 = vector.broadcast %175 : f32 to vector<8x128xf32>
    %177 = arith.mulf %176, %6 : vector<8x128xf32>
    %c14_45 = arith.constant 14 : index
    %178 = memref.load %arg2[%c14_45] : memref<32xf32, #tpu.memory_space<smem>>
    %179 = vector.broadcast %178 : f32 to vector<8x128xf32>
    %180 = arith.addf %177, %179 : vector<8x128xf32>
    %cst_46 = arith.constant 0.000000e+00 : f32
    %181 = vector.broadcast %cst_46 : f32 to vector<8x128xf32>
    %182 = arith.maximumf %180, %181 : vector<8x128xf32>
    %183 = vector.broadcast %174 : f32 to vector<8x128xf32>
    %184 = arith.mulf %183, %182 : vector<8x128xf32>
    %185 = arith.addf %173, %184 : vector<8x128xf32>
    %c15 = arith.constant 15 : index
    %186 = memref.load %arg3[%c15] : memref<32xf32, #tpu.memory_space<smem>>
    %c15_47 = arith.constant 15 : index
    %187 = memref.load %arg1[%c15_47] : memref<32xf32, #tpu.memory_space<smem>>
    %188 = vector.broadcast %187 : f32 to vector<8x128xf32>
    %189 = arith.mulf %188, %6 : vector<8x128xf32>
    %c15_48 = arith.constant 15 : index
    %190 = memref.load %arg2[%c15_48] : memref<32xf32, #tpu.memory_space<smem>>
    %191 = vector.broadcast %190 : f32 to vector<8x128xf32>
    %192 = arith.addf %189, %191 : vector<8x128xf32>
    %cst_49 = arith.constant 0.000000e+00 : f32
    %193 = vector.broadcast %cst_49 : f32 to vector<8x128xf32>
    %194 = arith.maximumf %192, %193 : vector<8x128xf32>
    %195 = vector.broadcast %186 : f32 to vector<8x128xf32>
    %196 = arith.mulf %195, %194 : vector<8x128xf32>
    %197 = arith.addf %185, %196 : vector<8x128xf32>
    %c16 = arith.constant 16 : index
    %198 = memref.load %arg3[%c16] : memref<32xf32, #tpu.memory_space<smem>>
    %c16_50 = arith.constant 16 : index
    %199 = memref.load %arg1[%c16_50] : memref<32xf32, #tpu.memory_space<smem>>
    %200 = vector.broadcast %199 : f32 to vector<8x128xf32>
    %201 = arith.mulf %200, %6 : vector<8x128xf32>
    %c16_51 = arith.constant 16 : index
    %202 = memref.load %arg2[%c16_51] : memref<32xf32, #tpu.memory_space<smem>>
    %203 = vector.broadcast %202 : f32 to vector<8x128xf32>
    %204 = arith.addf %201, %203 : vector<8x128xf32>
    %cst_52 = arith.constant 0.000000e+00 : f32
    %205 = vector.broadcast %cst_52 : f32 to vector<8x128xf32>
    %206 = arith.maximumf %204, %205 : vector<8x128xf32>
    %207 = vector.broadcast %198 : f32 to vector<8x128xf32>
    %208 = arith.mulf %207, %206 : vector<8x128xf32>
    %209 = arith.addf %197, %208 : vector<8x128xf32>
    %c17 = arith.constant 17 : index
    %210 = memref.load %arg3[%c17] : memref<32xf32, #tpu.memory_space<smem>>
    %c17_53 = arith.constant 17 : index
    %211 = memref.load %arg1[%c17_53] : memref<32xf32, #tpu.memory_space<smem>>
    %212 = vector.broadcast %211 : f32 to vector<8x128xf32>
    %213 = arith.mulf %212, %6 : vector<8x128xf32>
    %c17_54 = arith.constant 17 : index
    %214 = memref.load %arg2[%c17_54] : memref<32xf32, #tpu.memory_space<smem>>
    %215 = vector.broadcast %214 : f32 to vector<8x128xf32>
    %216 = arith.addf %213, %215 : vector<8x128xf32>
    %cst_55 = arith.constant 0.000000e+00 : f32
    %217 = vector.broadcast %cst_55 : f32 to vector<8x128xf32>
    %218 = arith.maximumf %216, %217 : vector<8x128xf32>
    %219 = vector.broadcast %210 : f32 to vector<8x128xf32>
    %220 = arith.mulf %219, %218 : vector<8x128xf32>
    %221 = arith.addf %209, %220 : vector<8x128xf32>
    %c18 = arith.constant 18 : index
    %222 = memref.load %arg3[%c18] : memref<32xf32, #tpu.memory_space<smem>>
    %c18_56 = arith.constant 18 : index
    %223 = memref.load %arg1[%c18_56] : memref<32xf32, #tpu.memory_space<smem>>
    %224 = vector.broadcast %223 : f32 to vector<8x128xf32>
    %225 = arith.mulf %224, %6 : vector<8x128xf32>
    %c18_57 = arith.constant 18 : index
    %226 = memref.load %arg2[%c18_57] : memref<32xf32, #tpu.memory_space<smem>>
    %227 = vector.broadcast %226 : f32 to vector<8x128xf32>
    %228 = arith.addf %225, %227 : vector<8x128xf32>
    %cst_58 = arith.constant 0.000000e+00 : f32
    %229 = vector.broadcast %cst_58 : f32 to vector<8x128xf32>
    %230 = arith.maximumf %228, %229 : vector<8x128xf32>
    %231 = vector.broadcast %222 : f32 to vector<8x128xf32>
    %232 = arith.mulf %231, %230 : vector<8x128xf32>
    %233 = arith.addf %221, %232 : vector<8x128xf32>
    %c19 = arith.constant 19 : index
    %234 = memref.load %arg3[%c19] : memref<32xf32, #tpu.memory_space<smem>>
    %c19_59 = arith.constant 19 : index
    %235 = memref.load %arg1[%c19_59] : memref<32xf32, #tpu.memory_space<smem>>
    %236 = vector.broadcast %235 : f32 to vector<8x128xf32>
    %237 = arith.mulf %236, %6 : vector<8x128xf32>
    %c19_60 = arith.constant 19 : index
    %238 = memref.load %arg2[%c19_60] : memref<32xf32, #tpu.memory_space<smem>>
    %239 = vector.broadcast %238 : f32 to vector<8x128xf32>
    %240 = arith.addf %237, %239 : vector<8x128xf32>
    %cst_61 = arith.constant 0.000000e+00 : f32
    %241 = vector.broadcast %cst_61 : f32 to vector<8x128xf32>
    %242 = arith.maximumf %240, %241 : vector<8x128xf32>
    %243 = vector.broadcast %234 : f32 to vector<8x128xf32>
    %244 = arith.mulf %243, %242 : vector<8x128xf32>
    %245 = arith.addf %233, %244 : vector<8x128xf32>
    %c20 = arith.constant 20 : index
    %246 = memref.load %arg3[%c20] : memref<32xf32, #tpu.memory_space<smem>>
    %c20_62 = arith.constant 20 : index
    %247 = memref.load %arg1[%c20_62] : memref<32xf32, #tpu.memory_space<smem>>
    %248 = vector.broadcast %247 : f32 to vector<8x128xf32>
    %249 = arith.mulf %248, %6 : vector<8x128xf32>
    %c20_63 = arith.constant 20 : index
    %250 = memref.load %arg2[%c20_63] : memref<32xf32, #tpu.memory_space<smem>>
    %251 = vector.broadcast %250 : f32 to vector<8x128xf32>
    %252 = arith.addf %249, %251 : vector<8x128xf32>
    %cst_64 = arith.constant 0.000000e+00 : f32
    %253 = vector.broadcast %cst_64 : f32 to vector<8x128xf32>
    %254 = arith.maximumf %252, %253 : vector<8x128xf32>
    %255 = vector.broadcast %246 : f32 to vector<8x128xf32>
    %256 = arith.mulf %255, %254 : vector<8x128xf32>
    %257 = arith.addf %245, %256 : vector<8x128xf32>
    %c21 = arith.constant 21 : index
    %258 = memref.load %arg3[%c21] : memref<32xf32, #tpu.memory_space<smem>>
    %c21_65 = arith.constant 21 : index
    %259 = memref.load %arg1[%c21_65] : memref<32xf32, #tpu.memory_space<smem>>
    %260 = vector.broadcast %259 : f32 to vector<8x128xf32>
    %261 = arith.mulf %260, %6 : vector<8x128xf32>
    %c21_66 = arith.constant 21 : index
    %262 = memref.load %arg2[%c21_66] : memref<32xf32, #tpu.memory_space<smem>>
    %263 = vector.broadcast %262 : f32 to vector<8x128xf32>
    %264 = arith.addf %261, %263 : vector<8x128xf32>
    %cst_67 = arith.constant 0.000000e+00 : f32
    %265 = vector.broadcast %cst_67 : f32 to vector<8x128xf32>
    %266 = arith.maximumf %264, %265 : vector<8x128xf32>
    %267 = vector.broadcast %258 : f32 to vector<8x128xf32>
    %268 = arith.mulf %267, %266 : vector<8x128xf32>
    %269 = arith.addf %257, %268 : vector<8x128xf32>
    %c22 = arith.constant 22 : index
    %270 = memref.load %arg3[%c22] : memref<32xf32, #tpu.memory_space<smem>>
    %c22_68 = arith.constant 22 : index
    %271 = memref.load %arg1[%c22_68] : memref<32xf32, #tpu.memory_space<smem>>
    %272 = vector.broadcast %271 : f32 to vector<8x128xf32>
    %273 = arith.mulf %272, %6 : vector<8x128xf32>
    %c22_69 = arith.constant 22 : index
    %274 = memref.load %arg2[%c22_69] : memref<32xf32, #tpu.memory_space<smem>>
    %275 = vector.broadcast %274 : f32 to vector<8x128xf32>
    %276 = arith.addf %273, %275 : vector<8x128xf32>
    %cst_70 = arith.constant 0.000000e+00 : f32
    %277 = vector.broadcast %cst_70 : f32 to vector<8x128xf32>
    %278 = arith.maximumf %276, %277 : vector<8x128xf32>
    %279 = vector.broadcast %270 : f32 to vector<8x128xf32>
    %280 = arith.mulf %279, %278 : vector<8x128xf32>
    %281 = arith.addf %269, %280 : vector<8x128xf32>
    %c23 = arith.constant 23 : index
    %282 = memref.load %arg3[%c23] : memref<32xf32, #tpu.memory_space<smem>>
    %c23_71 = arith.constant 23 : index
    %283 = memref.load %arg1[%c23_71] : memref<32xf32, #tpu.memory_space<smem>>
    %284 = vector.broadcast %283 : f32 to vector<8x128xf32>
    %285 = arith.mulf %284, %6 : vector<8x128xf32>
    %c23_72 = arith.constant 23 : index
    %286 = memref.load %arg2[%c23_72] : memref<32xf32, #tpu.memory_space<smem>>
    %287 = vector.broadcast %286 : f32 to vector<8x128xf32>
    %288 = arith.addf %285, %287 : vector<8x128xf32>
    %cst_73 = arith.constant 0.000000e+00 : f32
    %289 = vector.broadcast %cst_73 : f32 to vector<8x128xf32>
    %290 = arith.maximumf %288, %289 : vector<8x128xf32>
    %291 = vector.broadcast %282 : f32 to vector<8x128xf32>
    %292 = arith.mulf %291, %290 : vector<8x128xf32>
    %293 = arith.addf %281, %292 : vector<8x128xf32>
    %c24 = arith.constant 24 : index
    %294 = memref.load %arg3[%c24] : memref<32xf32, #tpu.memory_space<smem>>
    %c24_74 = arith.constant 24 : index
    %295 = memref.load %arg1[%c24_74] : memref<32xf32, #tpu.memory_space<smem>>
    %296 = vector.broadcast %295 : f32 to vector<8x128xf32>
    %297 = arith.mulf %296, %6 : vector<8x128xf32>
    %c24_75 = arith.constant 24 : index
    %298 = memref.load %arg2[%c24_75] : memref<32xf32, #tpu.memory_space<smem>>
    %299 = vector.broadcast %298 : f32 to vector<8x128xf32>
    %300 = arith.addf %297, %299 : vector<8x128xf32>
    %cst_76 = arith.constant 0.000000e+00 : f32
    %301 = vector.broadcast %cst_76 : f32 to vector<8x128xf32>
    %302 = arith.maximumf %300, %301 : vector<8x128xf32>
    %303 = vector.broadcast %294 : f32 to vector<8x128xf32>
    %304 = arith.mulf %303, %302 : vector<8x128xf32>
    %305 = arith.addf %293, %304 : vector<8x128xf32>
    %c25 = arith.constant 25 : index
    %306 = memref.load %arg3[%c25] : memref<32xf32, #tpu.memory_space<smem>>
    %c25_77 = arith.constant 25 : index
    %307 = memref.load %arg1[%c25_77] : memref<32xf32, #tpu.memory_space<smem>>
    %308 = vector.broadcast %307 : f32 to vector<8x128xf32>
    %309 = arith.mulf %308, %6 : vector<8x128xf32>
    %c25_78 = arith.constant 25 : index
    %310 = memref.load %arg2[%c25_78] : memref<32xf32, #tpu.memory_space<smem>>
    %311 = vector.broadcast %310 : f32 to vector<8x128xf32>
    %312 = arith.addf %309, %311 : vector<8x128xf32>
    %cst_79 = arith.constant 0.000000e+00 : f32
    %313 = vector.broadcast %cst_79 : f32 to vector<8x128xf32>
    %314 = arith.maximumf %312, %313 : vector<8x128xf32>
    %315 = vector.broadcast %306 : f32 to vector<8x128xf32>
    %316 = arith.mulf %315, %314 : vector<8x128xf32>
    %317 = arith.addf %305, %316 : vector<8x128xf32>
    %c26 = arith.constant 26 : index
    %318 = memref.load %arg3[%c26] : memref<32xf32, #tpu.memory_space<smem>>
    %c26_80 = arith.constant 26 : index
    %319 = memref.load %arg1[%c26_80] : memref<32xf32, #tpu.memory_space<smem>>
    %320 = vector.broadcast %319 : f32 to vector<8x128xf32>
    %321 = arith.mulf %320, %6 : vector<8x128xf32>
    %c26_81 = arith.constant 26 : index
    %322 = memref.load %arg2[%c26_81] : memref<32xf32, #tpu.memory_space<smem>>
    %323 = vector.broadcast %322 : f32 to vector<8x128xf32>
    %324 = arith.addf %321, %323 : vector<8x128xf32>
    %cst_82 = arith.constant 0.000000e+00 : f32
    %325 = vector.broadcast %cst_82 : f32 to vector<8x128xf32>
    %326 = arith.maximumf %324, %325 : vector<8x128xf32>
    %327 = vector.broadcast %318 : f32 to vector<8x128xf32>
    %328 = arith.mulf %327, %326 : vector<8x128xf32>
    %329 = arith.addf %317, %328 : vector<8x128xf32>
    %c27 = arith.constant 27 : index
    %330 = memref.load %arg3[%c27] : memref<32xf32, #tpu.memory_space<smem>>
    %c27_83 = arith.constant 27 : index
    %331 = memref.load %arg1[%c27_83] : memref<32xf32, #tpu.memory_space<smem>>
    %332 = vector.broadcast %331 : f32 to vector<8x128xf32>
    %333 = arith.mulf %332, %6 : vector<8x128xf32>
    %c27_84 = arith.constant 27 : index
    %334 = memref.load %arg2[%c27_84] : memref<32xf32, #tpu.memory_space<smem>>
    %335 = vector.broadcast %334 : f32 to vector<8x128xf32>
    %336 = arith.addf %333, %335 : vector<8x128xf32>
    %cst_85 = arith.constant 0.000000e+00 : f32
    %337 = vector.broadcast %cst_85 : f32 to vector<8x128xf32>
    %338 = arith.maximumf %336, %337 : vector<8x128xf32>
    %339 = vector.broadcast %330 : f32 to vector<8x128xf32>
    %340 = arith.mulf %339, %338 : vector<8x128xf32>
    %341 = arith.addf %329, %340 : vector<8x128xf32>
    %c28 = arith.constant 28 : index
    %342 = memref.load %arg3[%c28] : memref<32xf32, #tpu.memory_space<smem>>
    %c28_86 = arith.constant 28 : index
    %343 = memref.load %arg1[%c28_86] : memref<32xf32, #tpu.memory_space<smem>>
    %344 = vector.broadcast %343 : f32 to vector<8x128xf32>
    %345 = arith.mulf %344, %6 : vector<8x128xf32>
    %c28_87 = arith.constant 28 : index
    %346 = memref.load %arg2[%c28_87] : memref<32xf32, #tpu.memory_space<smem>>
    %347 = vector.broadcast %346 : f32 to vector<8x128xf32>
    %348 = arith.addf %345, %347 : vector<8x128xf32>
    %cst_88 = arith.constant 0.000000e+00 : f32
    %349 = vector.broadcast %cst_88 : f32 to vector<8x128xf32>
    %350 = arith.maximumf %348, %349 : vector<8x128xf32>
    %351 = vector.broadcast %342 : f32 to vector<8x128xf32>
    %352 = arith.mulf %351, %350 : vector<8x128xf32>
    %353 = arith.addf %341, %352 : vector<8x128xf32>
    %c29 = arith.constant 29 : index
    %354 = memref.load %arg3[%c29] : memref<32xf32, #tpu.memory_space<smem>>
    %c29_89 = arith.constant 29 : index
    %355 = memref.load %arg1[%c29_89] : memref<32xf32, #tpu.memory_space<smem>>
    %356 = vector.broadcast %355 : f32 to vector<8x128xf32>
    %357 = arith.mulf %356, %6 : vector<8x128xf32>
    %c29_90 = arith.constant 29 : index
    %358 = memref.load %arg2[%c29_90] : memref<32xf32, #tpu.memory_space<smem>>
    %359 = vector.broadcast %358 : f32 to vector<8x128xf32>
    %360 = arith.addf %357, %359 : vector<8x128xf32>
    %cst_91 = arith.constant 0.000000e+00 : f32
    %361 = vector.broadcast %cst_91 : f32 to vector<8x128xf32>
    %362 = arith.maximumf %360, %361 : vector<8x128xf32>
    %363 = vector.broadcast %354 : f32 to vector<8x128xf32>
    %364 = arith.mulf %363, %362 : vector<8x128xf32>
    %365 = arith.addf %353, %364 : vector<8x128xf32>
    %c30 = arith.constant 30 : index
    %366 = memref.load %arg3[%c30] : memref<32xf32, #tpu.memory_space<smem>>
    %c30_92 = arith.constant 30 : index
    %367 = memref.load %arg1[%c30_92] : memref<32xf32, #tpu.memory_space<smem>>
    %368 = vector.broadcast %367 : f32 to vector<8x128xf32>
    %369 = arith.mulf %368, %6 : vector<8x128xf32>
    %c30_93 = arith.constant 30 : index
    %370 = memref.load %arg2[%c30_93] : memref<32xf32, #tpu.memory_space<smem>>
    %371 = vector.broadcast %370 : f32 to vector<8x128xf32>
    %372 = arith.addf %369, %371 : vector<8x128xf32>
    %cst_94 = arith.constant 0.000000e+00 : f32
    %373 = vector.broadcast %cst_94 : f32 to vector<8x128xf32>
    %374 = arith.maximumf %372, %373 : vector<8x128xf32>
    %375 = vector.broadcast %366 : f32 to vector<8x128xf32>
    %376 = arith.mulf %375, %374 : vector<8x128xf32>
    %377 = arith.addf %365, %376 : vector<8x128xf32>
    %c31 = arith.constant 31 : index
    %378 = memref.load %arg3[%c31] : memref<32xf32, #tpu.memory_space<smem>>
    %c31_95 = arith.constant 31 : index
    %379 = memref.load %arg1[%c31_95] : memref<32xf32, #tpu.memory_space<smem>>
    %380 = vector.broadcast %379 : f32 to vector<8x128xf32>
    %381 = arith.mulf %380, %6 : vector<8x128xf32>
    %c31_96 = arith.constant 31 : index
    %382 = memref.load %arg2[%c31_96] : memref<32xf32, #tpu.memory_space<smem>>
    %383 = vector.broadcast %382 : f32 to vector<8x128xf32>
    %384 = arith.addf %381, %383 : vector<8x128xf32>
    %cst_97 = arith.constant 0.000000e+00 : f32
    %385 = vector.broadcast %cst_97 : f32 to vector<8x128xf32>
    %386 = arith.maximumf %384, %385 : vector<8x128xf32>
    %387 = vector.broadcast %378 : f32 to vector<8x128xf32>
    %388 = arith.mulf %387, %386 : vector<8x128xf32>
    %389 = arith.addf %377, %388 : vector<8x128xf32>
    %390 = vector.broadcast %0 : f32 to vector<8x128xf32>
    %391 = arith.addf %389, %390 : vector<8x128xf32>
    %cst_98 = arith.constant 0.000000e+00 : f32
    %392 = vector.broadcast %cst_98 : f32 to vector<8x128xf32>
    %393 = arith.maximumf %391, %392 : vector<8x128xf32>
    %394 = math.absf %391 : vector<8x128xf32>
    %cst_99 = arith.constant 0.000000e+00 : f32
    %395 = vector.broadcast %cst_99 : f32 to vector<8x128xf32>
    %396 = arith.subf %395, %394 : vector<8x128xf32>
    %397 = math.exp %396 : vector<8x128xf32>
    %398 = math.log1p %397 : vector<8x128xf32>
    %399 = arith.addf %393, %398 : vector<8x128xf32>
    %400 = arith.index_cast %4 : i32 to index
    %c0_100 = arith.constant 0 : index
    %401 = vector.load %arg6[%400, %c0_100] : memref<8x128xf32, #tpu.memory_space<vmem>>, vector<8x128xf32>
    tpu.vector_store %arg6[%400, %c0_100], %399 {strides = array<i32>} : memref<8x128xf32, #tpu.memory_space<vmem>>, vector<8x128xf32>,
    %c1_i32_101 = arith.constant 1 : i32
    return
  }
  func.func @transform_0(%arg0: i32) -> i32 {
    %c0_i32 = arith.constant 0 : i32
    %c0_i32_0 = arith.constant 0 : i32
    return %c0_i32 : i32
  }
  func.func @transform_1(%arg0: i32) -> i32 {
    %c0_i32 = arith.constant 0 : i32
    %c0_i32_0 = arith.constant 0 : i32
    return %c0_i32 : i32
  }
  func.func @transform_2(%arg0: i32) -> i32 {
    %c0_i32 = arith.constant 0 : i32
    %c0_i32_0 = arith.constant 0 : i32
    return %c0_i32 : i32
  }
  func.func @transform_3(%arg0: i32) -> i32 {
    %c0_i32 = arith.constant 0 : i32
    %c0_i32_0 = arith.constant 0 : i32
    return %c0_i32 : i32
  }
  func.func @transform_4(%arg0: i32) -> (i32, i32) {
    %c0_i32 = arith.constant 0 : i32
    %c0_i32_0 = arith.constant 0 : i32
    return %arg0, %c0_i32 : i32, i32
  }
  func.func @transform_5(%arg0: i32) -> (i32, i32) {
    %c0_i32 = arith.constant 0 : i32
    %c0_i32_0 = arith.constant 0 : i32
    return %arg0, %c0_i32 : i32, i32
  }
}

</mosaic_0001>

<bundles_post_ra>
// kernel: tpu_custom_call.1
= control target key start
LH: loop header
LB: loop body
LE: loop exit
PB: predicated region body
PF: predicated region fallthrough
CT: control target
= control target key end

     0   :  { %11 = vsyncpa [#allocation5], 0  ;;  %s972_s0 = inlined_call_operand.vmem [shape: f32[32], index: 0, kind: input, shape index: {}]   ;;  %s973_s1 = inlined_call_operand.vmem [shape: f32[32], index: 1, kind: input, shape index: {}]   ;;  %s974_s2 = inlined_call_operand.vmem [shape: f32[32], index: 2, kind: input, shape index: {}]   ;;  %s975_s3 = inlined_call_operand.<no memory space> [shape: f32[1], index: 3, kind: input, shape index: {}]   ;;  %s976_s4 = inlined_call_operand.vmem [shape: f32[8,128], index: 4, kind: input, shape index: {}]   ;;  %s977_s5 = inlined_call_operand.hbm [shape: f32[8,128], index: 5, kind: output, shape index: {}]  }
   0x1   :  { %12 = vsyncpa [#allocation7], 0  ;;  %s30_s20 = sshll.u32 %s973_s1, 4  ;;  %s31_s20 = int_to_ptr.vmem [resolvable:$true] %s30_s20 }
   0x2   :  { %13 = vsyncpa [#allocation4], 0  ;;  %s20_s23 = sshll.u32 %s972_s0, 4  ;;  %s546_s24 = scalar_lea.vmem %s31_s20, 16  ;;  %s21_s23 = int_to_ptr.vmem [resolvable:$true] %s20_s23 }
   0x3   :  { %p547_p0 = scmp.ne.s32.totalorder %s31_s20, %s546_s24  ;;  %p551_p1 = scmp.lt.s32.totalorder %s31_s20, %s31_s20 }
   0x4   :  { %p552_p2 = scmp.lt.s32.totalorder %s546_s24, %s546_s24 }
   0x6   :  { %p553_p3 = por %p552_p2, %p551_p1 }
   0x8   :  { %p554_p4 = pnand %p553_p3, %p547_p0 }
   0xa   :  { %557 = shalt.err (!%p554_p4)
}
   0xb   :  { %s610_s25 = smov [#allocation6]   ;;  %s558_s26 = scalar_lea.vmem %s21_s23, 16 }
   0xc   :  { %33 = dma.vmem_to_smem %s31_s20, 16, %s610_s25, [#allocation7]  }
   0xd   :  { %p559_p5 = scmp.ne.s32.totalorder %s21_s23, %s558_s26  ;;  %p563_p6 = scmp.lt.s32.totalorder %s21_s23, %s21_s23 }
   0xe   :  { %p564_p7 = scmp.lt.s32.totalorder %s558_s26, %s558_s26 }
  0x10   :  { %p565_p8 = por %p564_p7, %p563_p6 }
  0x12   :  { %p566_p9 = pnand %p565_p8, %p559_p5 }
  0x14   :  { %569 = shalt.err (!%p566_p9)
}
  0x15   :  { %s611_s1 = smov [#allocation3]   ;;  %s40_s28 = sshll.u32 %s974_s2, 4  ;;  %s41_s28 = int_to_ptr.vmem [resolvable:$true] %s40_s28 }
  0x16   :  { %23 = dma.vmem_to_smem %s21_s23, 16, %s611_s1, [#allocation5]  }
  0x17   :  { %s570_s29 = scalar_lea.vmem %s41_s28, 16  ;;  %p575_p11 = scmp.lt.s32.totalorder %s41_s28, %s41_s28 }
  0x18   :  { %p571_p10 = scmp.ne.s32.totalorder %s41_s28, %s570_s29  ;;  %p576_p12 = scmp.lt.s32.totalorder %s570_s29, %s570_s29 }
  0x1a   :  { %p577_p13 = por %p576_p12, %p575_p11 }
  0x1c   :  { %p578_p0 = pnand %p577_p13, %p571_p10 }
  0x1e   :  { %581 = shalt.err (!%p578_p0)
}
  0x1f   :  { %s612_s30 = smov [#allocation8]  }
  0x20   :  { %43 = dma.vmem_to_smem %s41_s28, 16, %s612_s30, [#allocation7]  }
  0x21   :  { %604 = dma.done.wait [#allocation5], 16  }
  0x22   :  { %605 = vsyncadd [#allocation5], 4294967280 }
  0x23   :  { %606 = dma.done.wait [#allocation7], 32  }
  0x24   :  { %607 = vsyncadd [#allocation7], 4294967264 }
  0x25   :  { %57 = sfence }
  0x26   :  { %s653_s6 = sld [smem:[#allocation8]]  ;;  %s655_s2 = sld [smem:[#allocation8 + $0x1]]  ;;  %v662_v0 = vld [vmem:[%s976_s4] sm:$0xff] }
  0x27   :  { %s61_s7 = sld [smem:[#allocation3]]  ;;  %s446_s9 = sld [smem:[#allocation3 + $0x1]] }
  0x28   :  { %s64_s8 = sld [smem:[#allocation6]]  ;;  %s447_s10 = sld [smem:[#allocation6 + $0x1]] }
  0x29   :  { %s657_s11 = sld [smem:[#allocation8 + $0x2]]  ;;  %s666_s16 = sld [smem:[#allocation8 + $0x3]] }
  0x2a   :  { %s449_s12 = sld [smem:[#allocation3 + $0x2]]  ;;  %s452_s17 = sld [smem:[#allocation3 + $0x3]] }
  0x2b   :  { %s664_s15 = sld [smem:[#allocation6 + $0x2]]  ;;  %s668_s18 = sld [smem:[#allocation6 + $0x3]] }
  0x2c   :  { %s670_s19 = sld [smem:[#allocation3 + $0x4]]  ;;  %s677_s21 = sld [smem:[#allocation3 + $0x5]]  ;;  %v68_v7 = vstv %s653_s6  ;;  %v78_v10 = vstv %s655_s2 }
  0x2d   :  { %v62_v1 = vstv %s61_s7  ;;  %s673_s20 = sld [smem:[#allocation8 + $0x4]]  ;;  %v72_v4 = vstv %s446_s9  ;;  %s679_s22 = sld [smem:[#allocation6 + $0x5]] }
  0x2e   :  { %v63_v2 = vmul.f32 %v62_v1, %v662_v0  ;;  %v65_v3 = vstv %s64_s8  ;;  %s675_s4 = sld [smem:[#allocation6 + $0x4]]  ;;  %v75_v5 = vstv %s447_s10  ;;  %v73_v8 = vmul.f32 %v72_v4, %v662_v0  ;;  %s683_s23 = sld [smem:[#allocation3 + $0x6]] }
  0x2f   :  { %v89_v13 = vstv %s657_s11  ;;  %s689_s24 = sld [smem:[#allocation8 + $0x5]]  ;;  %s691_s25 = sld [smem:[#allocation6 + $0x6]]  ;;  %v100_v20 = vstv %s666_s16 }
  0x30   :  { %v66_v6 = vadd.f32 %v65_v3, %v63_v2  ;;  %v83_v9 = vstv %s449_s12  ;;  %v76_v15 = vadd.f32 %v75_v5, %v73_v8  ;;  %v94_v16 = vstv %s452_s17  ;;  %s694_s26 = sld [smem:[#allocation3 + $0x7]]  ;;  %s701_s0 = sld [smem:[#allocation8 + $0x6]] }
  0x31   :  { %v84_v11 = vmul.f32 %v83_v9, %v662_v0  ;;  %v86_v12 = vstv %s664_s15  ;;  %v97_v17 = vstv %s668_s18  ;;  %s696_s1 = sld [smem:[#allocation6 + $0x7]]  ;;  %v95_v19 = vmul.f32 %v94_v16, %v662_v0  ;;  %s703_s27 = sld [smem:[#allocation3 + $0x8]] }
  0x32   :  { %v67_v14 = vmax.f32 %v66_v6, 0.0  ;;  %v105_v21 = vstv %s670_s19  ;;  %v77_v23 = vmax.f32 %v76_v15, 0.0  ;;  %s707_s28 = sld [smem:[#allocation8 + $0x7]]  ;;  %s709_s29 = sld [smem:[#allocation6 + $0x8]]  ;;  %v116_v28 = vstv %s677_s21 }
  0x33   :  { %v87_v18 = vadd.f32 %v86_v12, %v84_v11  ;;  %v106_v24 = vmul.f32 %v105_v21, %v662_v0  ;;  %v98_v27 = vadd.f32 %v97_v17, %v95_v19  ;;  %v119_v29 = vstv %s679_s22  ;;  %s713_s30 = sld [smem:[#allocation3 + $0x9]]  ;;  %s719_s7 = sld [smem:[#allocation8 + $0x8]] }
  0x34   :  { %v69_v22 = vmul.f32 %v68_v7, %v67_v14  ;;  %v108_v25 = vstv %s675_s4  ;;  %s715_s6 = sld [smem:[#allocation6 + $0x9]]  ;;  %v79_v30 = vmul.f32 %v78_v10, %v77_v23  ;;  %v111_v32 = vstv %s673_s20  ;;  %s723_s8 = sld [smem:[#allocation3 + $0xa]] }
  0x35   :  { %v88_v26 = vmax.f32 %v87_v18, 0.0  ;;  %v109_v31 = vadd.f32 %v108_v25, %v106_v24  ;;  %v117_v33 = vmul.f32 %v116_v28, %v662_v0  ;;  %v99_v35 = vmax.f32 %v98_v27, 0.0  ;;  %s725_s2 = sld [smem:[#allocation6 + $0xa]]  ;;  %s728_s9 = sld [smem:[#allocation8 + $0x9]] }
  0x36   :  { %v127_v36 = vstv %s683_s23  ;;  %v130_v37 = vstv %s691_s25  ;;  %v80_v38 = vadd.f32 %v79_v30, %v69_v22  ;;  %v122_v43 = vstv %s689_s24  ;;  %s733_s10 = sld [smem:[#allocation3 + $0xb]]  ;;  %s737_s12 = sld [smem:[#allocation8 + $0xa]] }
  0x37   :  { %v90_v34 = vmul.f32 %v89_v13, %v88_v26  ;;  %v110_v39 = vmax.f32 %v109_v31, 0.0  ;;  %v120_v40 = vadd.f32 %v119_v29, %v117_v33  ;;  %v128_v41 = vmul.f32 %v127_v36, %v662_v0  ;;  %s735_s11 = sld [smem:[#allocation6 + $0xb]]  ;;  %s743_s13 = sld [smem:[#allocation3 + $0xc]] }
  0x38   :  { %v101_v42 = vmul.f32 %v100_v20, %v99_v35  ;;  %v138_v44 = vstv %s694_s26  ;;  %v141_v45 = vstv %s696_s1  ;;  %v133_v50 = vstv %s701_s0  ;;  %s745_s14 = sld [smem:[#allocation6 + $0xc]]  ;;  %s748_s15 = sld [smem:[#allocation8 + $0xb]] }
  0x39   :  { %v91_v46 = vadd.f32 %v90_v34, %v80_v38  ;;  %v112_v47 = vmul.f32 %v111_v32, %v110_v39  ;;  %v121_v48 = vmax.f32 %v120_v40, 0.0  ;;  %v131_v49 = vadd.f32 %v130_v37, %v128_v41  ;;  %s753_s16 = sld [smem:[#allocation3 + $0xd]]  ;;  %s758_s18 = sld [smem:[#allocation8 + $0xc]] }
  0x3a   :  { %v139_v51 = vmul.f32 %v138_v44, %v662_v0  ;;  %v149_v52 = vstv %s703_s27  ;;  %v152_v53 = vstv %s709_s29  ;;  %v144_v59 = vstv %s707_s28  ;;  %s755_s17 = sld [smem:[#allocation6 + $0xd]]  ;;  %s763_s19 = sld [smem:[#allocation3 + $0xe]] }
  0x3b   :  { %v102_v54 = vadd.f32 %v101_v42, %v91_v46  ;;  %v123_v55 = vmul.f32 %v122_v43, %v121_v48  ;;  %v132_v56 = vmax.f32 %v131_v49, 0.0  ;;  %v150_v57 = vmul.f32 %v149_v52, %v662_v0  ;;  %s765_s20 = sld [smem:[#allocation6 + $0xe]]  ;;  %s768_s4 = sld [smem:[#allocation8 + $0xd]] }
  0x3c   :  { %v142_v58 = vadd.f32 %v141_v45, %v139_v51  ;;  %v160_v60 = vstv %s713_s30  ;;  %v163_v61 = vstv %s715_s6  ;;  %v155_v4 = vstv %s719_s7  ;;  %s773_s21 = sld [smem:[#allocation3 + $0xf]]  ;;  %s777_s23 = sld [smem:[#allocation8 + $0xe]] }
  0x3d   :  { %v113_v62 = vadd.f32 %v112_v47, %v102_v54  ;;  %v134_v63 = vmul.f32 %v133_v50, %v132_v56  ;;  %v153_v1 = vadd.f32 %v152_v53, %v150_v57  ;;  %v161_v2 = vmul.f32 %v160_v60, %v662_v0  ;;  %s775_s22 = sld [smem:[#allocation6 + $0xf]]  ;;  %s783_s24 = sld [smem:[#allocation3 + $0x10]] }
  0x3e   :  { %v143_v3 = vmax.f32 %v142_v58, 0.0  ;;  %v171_v5 = vstv %s723_s8  ;;  %v174_v6 = vstv %s725_s2  ;;  %v166_v12 = vstv %s728_s9  ;;  %s785_s25 = sld [smem:[#allocation6 + $0x10]]  ;;  %s788_s26 = sld [smem:[#allocation8 + $0xf]] }
  0x3f   :  { %v124_v7 = vadd.f32 %v123_v55, %v113_v62  ;;  %v154_v8 = vmax.f32 %v153_v1, 0.0  ;;  %v164_v9 = vadd.f32 %v163_v61, %v161_v2  ;;  %v172_v10 = vmul.f32 %v171_v5, %v662_v0  ;;  %s793_s1 = sld [smem:[#allocation3 + $0x11]]  ;;  %s798_s27 = sld [smem:[#allocation8 + $0x10]] }
  0x40   :  { %v145_v11 = vmul.f32 %v144_v59, %v143_v3  ;;  %v182_v13 = vstv %s733_s10  ;;  %v185_v14 = vstv %s735_s11  ;;  %v177_v19 = vstv %s737_s12  ;;  %s795_s0 = sld [smem:[#allocation6 + $0x11]]  ;;  %s803_s28 = sld [smem:[#allocation3 + $0x12]] }
  0x41   :  { %v135_v15 = vadd.f32 %v134_v63, %v124_v7  ;;  %v156_v16 = vmul.f32 %v155_v4, %v154_v8  ;;  %v165_v17 = vmax.f32 %v164_v9, 0.0  ;;  %v175_v18 = vadd.f32 %v174_v6, %v172_v10  ;;  %s805_s29 = sld [smem:[#allocation6 + $0x12]]  ;;  %s808_s30 = sld [smem:[#allocation8 + $0x11]] }
  0x42   :  { %v183_v20 = vmul.f32 %v182_v13, %v662_v0  ;;  %v193_v21 = vstv %s743_s13  ;;  %v196_v22 = vstv %s745_s14  ;;  %v188_v28 = vstv %s748_s15  ;;  %s813_s6 = sld [smem:[#allocation3 + $0x13]]  ;;  %s817_s8 = sld [smem:[#allocation8 + $0x12]] }
  0x43   :  { %v146_v23 = vadd.f32 %v145_v11, %v135_v15  ;;  %v167_v24 = vmul.f32 %v166_v12, %v165_v17  ;;  %v176_v25 = vmax.f32 %v175_v18, 0.0  ;;  %v194_v26 = vmul.f32 %v193_v21, %v662_v0  ;;  %s815_s7 = sld [smem:[#allocation6 + $0x13]]  ;;  %s823_s2 = sld [smem:[#allocation3 + $0x14]] }
  0x44   :  { %v186_v27 = vadd.f32 %v185_v14, %v183_v20  ;;  %v204_v29 = vstv %s753_s16  ;;  %v207_v30 = vstv %s755_s17  ;;  %v199_v36 = vstv %s758_s18  ;;  %s825_s9 = sld [smem:[#allocation6 + $0x14]]  ;;  %s828_s10 = sld [smem:[#allocation8 + $0x13]] }
  0x45   :  { %v157_v31 = vadd.f32 %v156_v16, %v146_v23  ;;  %v178_v32 = vmul.f32 %v177_v19, %v176_v25  ;;  %v197_v33 = vadd.f32 %v196_v22, %v194_v26  ;;  %v205_v34 = vmul.f32 %v204_v29, %v662_v0  ;;  %s833_s11 = sld [smem:[#allocation3 + $0x15]]  ;;  %s838_s13 = sld [smem:[#allocation8 + $0x14]] }
  0x46   :  { %v187_v35 = vmax.f32 %v186_v27, 0.0  ;;  %v215_v37 = vstv %s763_s19  ;;  %v218_v38 = vstv %s765_s20  ;;  %v210_v44 = vstv %s768_s4  ;;  %s835_s12 = sld [smem:[#allocation6 + $0x15]]  ;;  %s843_s14 = sld [smem:[#allocation3 + $0x16]] }
  0x47   :  { %v168_v39 = vadd.f32 %v167_v24, %v157_v31  ;;  %v198_v40 = vmax.f32 %v197_v33, 0.0  ;;  %v208_v41 = vadd.f32 %v207_v30, %v205_v34  ;;  %v216_v42 = vmul.f32 %v215_v37, %v662_v0  ;;  %s845_s15 = sld [smem:[#allocation6 + $0x16]]  ;;  %s848_s16 = sld [smem:[#allocation8 + $0x15]] }
  0x48   :  { %v189_v43 = vmul.f32 %v188_v28, %v187_v35  ;;  %v226_v45 = vstv %s773_s21  ;;  %v229_v46 = vstv %s775_s22  ;;  %v221_v51 = vstv %s777_s23  ;;  %s853_s17 = sld [smem:[#allocation3 + $0x17]]  ;;  %s857_s19 = sld [smem:[#allocation8 + $0x16]] }
  0x49   :  { %v179_v47 = vadd.f32 %v178_v32, %v168_v39  ;;  %v200_v48 = vmul.f32 %v199_v36, %v198_v40  ;;  %v209_v49 = vmax.f32 %v208_v41, 0.0  ;;  %v219_v50 = vadd.f32 %v218_v38, %v216_v42  ;;  %s855_s18 = sld [smem:[#allocation6 + $0x17]]  ;;  %s863_s20 = sld [smem:[#allocation3 + $0x18]] }
  0x4a   :  { %v227_v52 = vmul.f32 %v226_v45, %v662_v0  ;;  %v237_v53 = vstv %s783_s24  ;;  %v240_v54 = vstv %s785_s25  ;;  %v232_v60 = vstv %s788_s26  ;;  %s865_s4 = sld [smem:[#allocation6 + $0x18]]  ;;  %s868_s21 = sld [smem:[#allocation8 + $0x17]] }
  0x4b   :  { %v190_v55 = vadd.f32 %v189_v43, %v179_v47  ;;  %v211_v56 = vmul.f32 %v210_v44, %v209_v49  ;;  %v220_v57 = vmax.f32 %v219_v50, 0.0  ;;  %v238_v58 = vmul.f32 %v237_v53, %v662_v0  ;;  %s873_s22 = sld [smem:[#allocation3 + $0x19]]  ;;  %s878_s24 = sld [smem:[#allocation8 + $0x18]] }
  0x4c   :  { %v230_v59 = vadd.f32 %v229_v46, %v227_v52  ;;  %v248_v61 = vstv %s793_s1  ;;  %v251_v62 = vstv %s795_s0  ;;  %v243_v5 = vstv %s798_s27  ;;  %s875_s23 = sld [smem:[#allocation6 + $0x19]]  ;;  %s883_s25 = sld [smem:[#allocation3 + $0x1a]] }
  0x4d   :  { %v201_v63 = vadd.f32 %v200_v48, %v190_v55  ;;  %v222_v1 = vmul.f32 %v221_v51, %v220_v57  ;;  %v241_v2 = vadd.f32 %v240_v54, %v238_v58  ;;  %v249_v3 = vmul.f32 %v248_v61, %v662_v0  ;;  %s885_s26 = sld [smem:[#allocation6 + $0x1a]]  ;;  %s888_s1 = sld [smem:[#allocation8 + $0x19]] }
  0x4e   :  { %v231_v4 = vmax.f32 %v230_v59, 0.0  ;;  %v259_v6 = vstv %s803_s28  ;;  %v262_v7 = vstv %s805_s29  ;;  %v254_v13 = vstv %s808_s30  ;;  %s893_s0 = sld [smem:[#allocation3 + $0x1b]]  ;;  %s897_s28 = sld [smem:[#allocation8 + $0x1a]] }
  0x4f   :  { %v212_v8 = vadd.f32 %v211_v56, %v201_v63  ;;  %v242_v9 = vmax.f32 %v241_v2, 0.0  ;;  %v252_v10 = vadd.f32 %v251_v62, %v249_v3  ;;  %v260_v11 = vmul.f32 %v259_v6, %v662_v0  ;;  %s895_s27 = sld [smem:[#allocation6 + $0x1b]]  ;;  %s903_s29 = sld [smem:[#allocation3 + $0x1c]] }
  0x50   :  { %v233_v12 = vmul.f32 %v232_v60, %v231_v4  ;;  %v270_v14 = vstv %s813_s6  ;;  %v273_v15 = vstv %s815_s7  ;;  %v265_v20 = vstv %s817_s8  ;;  %s905_s30 = sld [smem:[#allocation6 + $0x1c]]  ;;  %s908_s6 = sld [smem:[#allocation8 + $0x1b]] }
  0x51   :  { %v223_v16 = vadd.f32 %v222_v1, %v212_v8  ;;  %v244_v17 = vmul.f32 %v243_v5, %v242_v9  ;;  %v253_v18 = vmax.f32 %v252_v10, 0.0  ;;  %v263_v19 = vadd.f32 %v262_v7, %v260_v11  ;;  %s913_s7 = sld [smem:[#allocation3 + $0x1d]] }
  0x52   :  { %v271_v21 = vmul.f32 %v270_v14, %v662_v0  ;;  %v281_v22 = vstv %s823_s2  ;;  %v284_v23 = vstv %s825_s9  ;;  %v276_v29 = vstv %s828_s10  ;;  %s915_s8 = sld [smem:[#allocation6 + $0x1d]]  ;;  %s918_s2 = sld [smem:[#allocation8 + $0x1c]] }
  0x53   :  { %v234_v24 = vadd.f32 %v233_v12, %v223_v16  ;;  %v255_v25 = vmul.f32 %v254_v13, %v253_v18  ;;  %v264_v26 = vmax.f32 %v263_v19, 0.0  ;;  %v282_v27 = vmul.f32 %v281_v22, %v662_v0  ;;  %s923_s9 = sld [smem:[#allocation3 + $0x1e]] }
  0x54   :  { %v274_v28 = vadd.f32 %v273_v15, %v271_v21  ;;  %v292_v30 = vstv %s833_s11  ;;  %v295_v31 = vstv %s835_s12  ;;  %v287_v37 = vstv %s838_s13  ;;  %s925_s10 = sld [smem:[#allocation6 + $0x1e]]  ;;  %s928_s11 = sld [smem:[#allocation8 + $0x1d]] }
  0x55   :  { %v245_v32 = vadd.f32 %v244_v17, %v234_v24  ;;  %v266_v33 = vmul.f32 %v265_v20, %v264_v26  ;;  %v285_v34 = vadd.f32 %v284_v23, %v282_v27  ;;  %v293_v35 = vmul.f32 %v292_v30, %v662_v0  ;;  %s933_s12 = sld [smem:[#allocation3 + $0x1f]] }
  0x56   :  { %v275_v36 = vmax.f32 %v274_v28, 0.0  ;;  %v303_v38 = vstv %s843_s14  ;;  %v306_v39 = vstv %s845_s15  ;;  %v298_v45 = vstv %s848_s16  ;;  %s935_s13 = sld [smem:[#allocation6 + $0x1f]]  ;;  %s941_s14 = sld [smem:[#allocation8 + $0x1e]] }
  0x57   :  { %v256_v40 = vadd.f32 %v255_v25, %v245_v32  ;;  %v286_v41 = vmax.f32 %v285_v34, 0.0  ;;  %v296_v42 = vadd.f32 %v295_v31, %v293_v35  ;;  %v304_v43 = vmul.f32 %v303_v38, %v662_v0  ;;  %s535_s15 = sld [smem:[#allocation8 + $0x1f]] }
  0x58   :  { %v277_v44 = vmul.f32 %v276_v29, %v275_v36  ;;  %v314_v46 = vstv %s853_s17  ;;  %v317_v47 = vstv %s855_s18  ;;  %v309_v52 = vstv %s857_s19  ;;  %s613_s18 = smov [#allocation9]  }
  0x59   :  { %v267_v48 = vadd.f32 %v266_v33, %v256_v40  ;;  %v288_v49 = vmul.f32 %v287_v37, %v286_v41  ;;  %v297_v50 = vmax.f32 %v296_v42, 0.0  ;;  %v307_v51 = vadd.f32 %v306_v39, %v304_v43  ;;  %s435_s19 = sshll.u32 %s613_s18, 4  ;;  %s436_s19 = int_to_ptr.vmem [resolvable:$true] %s435_s19 }
  0x5a   :  { %v315_v53 = vmul.f32 %v314_v46, %v662_v0  ;;  %v325_v54 = vstv %s863_s20  ;;  %v328_v55 = vstv %s865_s4  ;;  %v320_v61 = vstv %s868_s21  ;;  %p587_p2 = scmp.lt.s32.totalorder %s436_s19, %s436_s19 }
  0x5b   :  { %v278_v56 = vadd.f32 %v277_v44, %v267_v48  ;;  %v299_v57 = vmul.f32 %v298_v45, %v297_v50  ;;  %v308_v58 = vmax.f32 %v307_v51, 0.0  ;;  %v326_v59 = vmul.f32 %v325_v54, %v662_v0 }
  0x5c   :  { %v318_v60 = vadd.f32 %v317_v47, %v315_v53  ;;  %v336_v62 = vstv %s873_s22  ;;  %v339_v63 = vstv %s875_s23  ;;  %v331_v6 = vstv %s878_s24 }
  0x5d   :  { %v289_v1 = vadd.f32 %v288_v49, %v278_v56  ;;  %v310_v2 = vmul.f32 %v309_v52, %v308_v58  ;;  %v329_v3 = vadd.f32 %v328_v55, %v326_v59  ;;  %v337_v4 = vmul.f32 %v336_v62, %v662_v0 }
  0x5e   :  { %v319_v5 = vmax.f32 %v318_v60, 0.0  ;;  %v347_v7 = vstv %s883_s25  ;;  %v350_v8 = vstv %s885_s26  ;;  %v342_v14 = vstv %s888_s1 }
  0x5f   :  { %v300_v9 = vadd.f32 %v299_v57, %v289_v1  ;;  %v330_v10 = vmax.f32 %v329_v3, 0.0  ;;  %v340_v11 = vadd.f32 %v339_v63, %v337_v4  ;;  %v348_v12 = vmul.f32 %v347_v7, %v662_v0 }
  0x60   :  { %v321_v13 = vmul.f32 %v320_v61, %v319_v5  ;;  %v358_v15 = vstv %s893_s0  ;;  %v361_v16 = vstv %s895_s27  ;;  %v353_v21 = vstv %s897_s28 }
  0x61   :  { %v311_v17 = vadd.f32 %v310_v2, %v300_v9  ;;  %v332_v18 = vmul.f32 %v331_v6, %v330_v10  ;;  %v341_v19 = vmax.f32 %v340_v11, 0.0  ;;  %v351_v20 = vadd.f32 %v350_v8, %v348_v12 }
  0x62   :  { %v359_v22 = vmul.f32 %v358_v15, %v662_v0  ;;  %v369_v23 = vstv %s903_s29  ;;  %v372_v24 = vstv %s905_s30  ;;  %v364_v30 = vstv %s908_s6 }
  0x63   :  { %v322_v25 = vadd.f32 %v321_v13, %v311_v17  ;;  %v343_v26 = vmul.f32 %v342_v14, %v341_v19  ;;  %v352_v27 = vmax.f32 %v351_v20, 0.0  ;;  %v370_v28 = vmul.f32 %v369_v23, %v662_v0 }
  0x64   :  { %v362_v29 = vadd.f32 %v361_v16, %v359_v22  ;;  %v380_v31 = vstv %s913_s7  ;;  %v383_v32 = vstv %s915_s8  ;;  %v375_v38 = vstv %s918_s2 }
  0x65   :  { %v333_v33 = vadd.f32 %v332_v18, %v322_v25  ;;  %v354_v34 = vmul.f32 %v353_v21, %v352_v27  ;;  %v373_v35 = vadd.f32 %v372_v24, %v370_v28  ;;  %v381_v36 = vmul.f32 %v380_v31, %v662_v0 }
  0x66   :  { %v363_v37 = vmax.f32 %v362_v29, 0.0  ;;  %v391_v39 = vstv %s923_s9  ;;  %v394_v40 = vstv %s925_s10  ;;  %v386_v46 = vstv %s928_s11 }
  0x67   :  { %v344_v41 = vadd.f32 %v343_v26, %v333_v33  ;;  %v374_v42 = vmax.f32 %v373_v35, 0.0  ;;  %v384_v43 = vadd.f32 %v383_v32, %v381_v36  ;;  %v392_v44 = vmul.f32 %v391_v39, %v662_v0 }
  0x68   :  { %v365_v45 = vmul.f32 %v364_v30, %v363_v37  ;;  %v402_v47 = vstv %s933_s12  ;;  %v405_v48 = vstv %s935_s13  ;;  %v397_v53 = vstv %s941_s14 }
  0x69   :  { %v355_v49 = vadd.f32 %v354_v34, %v344_v41  ;;  %v376_v50 = vmul.f32 %v375_v38, %v374_v42  ;;  %v385_v51 = vmax.f32 %v384_v43, 0.0  ;;  %v395_v52 = vadd.f32 %v394_v40, %v392_v44 }
  0x6a   :  { %v403_v54 = vmul.f32 %v402_v47, %v662_v0  ;;  %v408_v61 = vstv %s535_s15  ;;  %v411_v3 = vstv %s975_s3  ;;  %s582_s3 = scalar_lea.vmem %s436_s19, 128 }
  0x6b   :  { %v366_v55 = vadd.f32 %v365_v45, %v355_v49  ;;  %v387_v56 = vmul.f32 %v386_v46, %v385_v51  ;;  %v396_v57 = vmax.f32 %v395_v52, 0.0  ;;  %p583_p1 = scmp.ne.s32.totalorder %s436_s19, %s582_s3  ;;  %p588_p3 = scmp.lt.s32.totalorder %s582_s3, %s582_s3 }
  0x6c   :  { %v406_v58 = vadd.f32 %v405_v48, %v403_v54 }
  0x6d   :  { %v377_v59 = vadd.f32 %v376_v50, %v366_v55  ;;  %v398_v60 = vmul.f32 %v397_v53, %v396_v57  ;;  %p589_p4 = por %p588_p3, %p587_p2 }
  0x6e   :  { %v407_v62 = vmax.f32 %v406_v58, 0.0 }
  0x6f   :  { %v388_v63 = vadd.f32 %v387_v56, %v377_v59  ;;  %p590_p5 = pnand %p589_p4, %p583_p1 }
  0x70   :  { %v409_v1 = vmul.f32 %v408_v61, %v407_v62 }
  0x71   :  { %v399_v2 = vadd.f32 %v398_v60, %v388_v63 }
  0x73   :  { %v410_v4 = vadd.f32 %v409_v1, %v399_v2 }
  0x75   :  { %v412_v5 = vadd.f32 %v411_v3, %v410_v4 }
  0x77   :  { %v414_v6 = vand.u32 2147483647, %v412_v5  ;;  %v413_v15 = vmax.f32 %v412_v5, 0.0 }
  0x79   :  { %v415_v7 = vsub.f32 0.0, %v414_v6 }
  0x7b   :  { %v416_v0 = vmul.f32 1.442695, %v415_v7 }
  0x7d   :  { %542 = vpow2.f32 %v416_v0 }
  0x87   :  { %v543_v8 = vpop.eup %542 }
  0x88   :  { %v418_v9 = vadd.f32 1.0, %v543_v8  ;;  %v421_v10 = vmul.f32 -0.5, %v543_v8  ;;  %v424_v12 = vand.u32 2147483647, %v543_v8 }
  0x8a   :  { %544 = vlog2.f32 %v418_v9  ;;  %v422_v11 = vadd.f32 1.0, %v421_v10  ;;  %vm425_vm0 = vcmp.lt.f32.partialorder %v424_v12, 0.0004427343 }
  0x8c   :  { %v423_v13 = vmul.f32 %v543_v8, %v422_v11 }
  0x94   :  { %v545_v14 = vpop.eup %544 }
  0x95   :  { %v420_v16 = vmul.f32 0.6931472, %v545_v14 }
  0x97   :  { %v426_v17 = vsel %vm425_vm0, %v423_v13, %v420_v16 }
  0x98   :  { %v427_v18 = vadd.f32 %v426_v17, %v413_v15 }
  0x9a   :  { %428 = vst [vmem:[#allocation9] sm:$0xff] %v427_v18 }
  0x9b   :  { %593 = shalt.err (!%p590_p5)
}
  0x9c   :  { %s594_s21 = scalar_lea.hbm %s977_s5, 128 }
  0x9d   :  { %p595_p6 = scmp.ne.s32.totalorder %s977_s5, %s594_s21  ;;  %p598_p7 = scmp.lt.u32.totalorder %s594_s21, %s977_s5 }
  0x9f   :  { %p600_p8 = pnand %p598_p7, %p595_p6 }
  0xa1   :  { %603 = shalt.err (!%p600_p8)
}
  0xa2   :  { %438 = dma.vmem_to_hbm [thread:$0]  %s436_s19, 128, %s977_s5, [#allocation4]  }
  0xa3   :  { %608 = dma.done.wait [#allocation4], 128  }
  0xa4   :  { %609 = vsyncadd [#allocation4], 4294967168 }
  0xa5   :  { %442 = vsyncpa [#allocation4], 1 }
  0xa6   :  { %443 = vsyncpa [#allocation5], 1 }
  0xa7   :  { %444 = vsyncpa [#allocation7], 1 }

</bundles_post_ra>
